<compile_context>
chip_gen: v7x
topology: tpu7x:2x2x1
jax: 0.10.0
libtpu: 0.0.40
codegen_flags: <defaults>
</compile_context>

<pallas_src>
import functools

import jax
import jax.numpy as jnp
from jax.experimental import pallas as pl
from jax.experimental.pallas import tpu as pltpu


def _round_up(n, m):
    return ((n + m - 1) // m) * m


def _act_dtype():
    """bf16 tanh/bias epilogue on v6e/v7x (bf16 VPU/EUP); f32 on v5e and older."""
    try:
        kind = jax.devices()[0].device_kind.lower()
    except Exception:
        return jnp.float32
    if ("v6" in kind) or ("v7" in kind) or ("7x" in kind) or ("trillium" in kind):
        return jnp.bfloat16
    return jnp.float32


# ~0.35 us per-grid-step overhead expressed in "rows of MXU work" (~3 ns/row
# for this 3-layer 256-wide MLP).  Used only by the trace-time tile chooser.
_STEP_OVERHEAD_ROWS = 128


def _choose_batch_tile(B, batch_tile, min_steps):
    """Pick (tb, b_pad): tb multiple of 8, padding bounded, step overhead amortized."""
    b8 = _round_up(max(B, 1), 8)
    cap = min(_round_up(max(batch_tile, 8), 8), b8)

    cands = {cap}
    for t in (1024, 512, 256, 128, 64, 32, 16, 8):
        if t <= cap:
            cands.add(t)
    # Low-padding candidates derived from splitting B into a few near-equal steps.
    for steps in (2, 3, 4, 6, 8):
        t = _round_up(pl.cdiv(B, steps), 8)
        if 8 <= t <= cap:
            cands.add(t)

    best = None
    for t in sorted(cands, reverse=True):
        b_pad = _round_up(B, t)
        steps = b_pad // t
        cost = steps * _STEP_OVERHEAD_ROWS + b_pad  # step overhead + padded MXU rows
        key = (steps < min_steps, cost, -t)
        if best is None or key < best[0]:
            best = (key, t, b_pad)
    return best[1], best[2]


def _fc_net_kernel(x_ref, w1_ref, b1_ref, w2_ref, b2_ref, w3_ref, b3_ref, out_ref,
                   *, act_dtype):
    # x_ref is a (TB, obs_dim) f32 tile; the cast to the MXU compute dtype is a
    # VPU op hidden under MXU slack.  All matmuls accumulate in f32.
    cd = w1_ref.dtype
    xc = x_ref[...].astype(cd)

    a1 = jnp.dot(xc, w1_ref[...], preferred_element_type=jnp.float32) + b1_ref[...]
    h1 = jnp.tanh(a1.astype(act_dtype))           # bf16 on v6e/v7x, f32 on v5e

    a2 = jnp.dot(h1.astype(cd), w2_ref[...],
                 preferred_element_type=jnp.float32) + b2_ref[...]
    h2 = jnp.tanh(a2.astype(act_dtype))

    logits = jnp.dot(h2.astype(cd), w3_ref[...],
                     preferred_element_type=jnp.float32) + b3_ref[...]
    out_ref[...] = logits.astype(out_ref.dtype)


def fc_net_forward(x, params, *, batch_tile=1024):
    """x: [B, obs_dim] array. params: dict of w1,b1,w2,b2,w3,b3 (w* pre-transposed [in,out])."""
    w1, b1 = params["w1"], params["b1"]
    w2, b2 = params["w2"], params["b2"]
    w3, b3 = params["w3"], params["b3"]

    B, obs_dim = x.shape
    hidden = w1.shape[1]
    num_outputs = w3.shape[1]

    # Mirrors input_dict['obs'].float(); the bf16 lowering for the MXU happens
    # inside the kernel (avoids a separate wrapper-side HBM round trip).
    x = x.astype(jnp.float32)

    # Lane-dense output: pad logits width (and w3/b3 columns) to a multiple of 128.
    n_pad = _round_up(num_outputs, 128)
    if n_pad != num_outputs:
        w3 = jnp.pad(w3, ((0, 0), (0, n_pad - num_outputs)))
        b3 = jnp.pad(b3, ((0, 0), (0, n_pad - num_outputs)))

    # Batch tile / grid: >= 2 steps whenever the batch allows (v7x megacore split
    # + DMA/compute overlap), padding waste bounded, step overhead amortized.
    min_steps = 2 if _round_up(B, 8) >= 16 else 1
    tb, b_pad = _choose_batch_tile(B, batch_tile, min_steps)
    if b_pad != B:
        x = jnp.pad(x, ((0, b_pad - B), (0, 0)))
    grid = (b_pad // tb,)

    # Advisory cost estimate so XLA can overlap this call with neighbors.
    flops = 2 * b_pad * (obs_dim * hidden + hidden * hidden + hidden * n_pad)
    bytes_accessed = (
        int(x.size) * x.dtype.itemsize
        + sum(int(a.size) * a.dtype.itemsize for a in (w1, b1, w2, b2, w3, b3))
        + b_pad * n_pad * 4
    )
    cost = pl.CostEstimate(
        flops=flops,
        transcendentals=2 * b_pad * hidden,
        bytes_accessed=bytes_accessed,
    )

    # Weights/biases: constant index_map -> resident in VMEM across grid steps.
    def resident(a):
        return pl.BlockSpec(a.shape, lambda i: (0, 0))

    kernel = functools.partial(_fc_net_kernel, act_dtype=_act_dtype())

    out = pl.pallas_call(
        kernel,
        out_shape=jax.ShapeDtypeStruct((b_pad, n_pad), jnp.float32),
        grid=grid,
        in_specs=[
            pl.BlockSpec((tb, obs_dim), lambda i: (i, 0)),
            resident(w1), resident(b1),
            resident(w2), resident(b2),
            resident(w3), resident(b3),
        ],
        out_specs=pl.BlockSpec((tb, n_pad), lambda i: (i, 0)),
        compiler_params=pltpu.CompilerParams(
            dimension_semantics=("parallel",),   # megacore split on v7x
        ),
        cost_estimate=cost,
    )(x, w1, b1, w2, b2, w3, b3)

    # Consumers that can handle the padded slab may take `out` directly; the
    # slice here restores the module's exact (B, num_outputs) f32 logits.
    return out[:B, :num_outputs]


def init_params(key, obs_dim, hidden, num_outputs, *, weight_dtype=jnp.bfloat16):
    """PyTorch-Linear-style init (uniform +/- 1/sqrt(fan_in)).

    Weights are stored transposed ([in, out]) relative to torch.nn.Linear and
    lowered to `weight_dtype` (bf16 for native MXU issue rate).  Biases stay f32.
    """
    ks = jax.random.split(key, 6)

    def lin(kw, kb, fan_in, fan_out):
        bound = 1.0 / jnp.sqrt(jnp.float32(fan_in))
        w = jax.random.uniform(kw, (fan_in, fan_out), jnp.float32, -bound, bound)
        b = jax.random.uniform(kb, (1, fan_out), jnp.float32, -bound, bound)
        return w.astype(weight_dtype), b

    w1, b1 = lin(ks[0], ks[1], obs_dim, hidden)
    w2, b2 = lin(ks[2], ks[3], hidden, hidden)
    w3, b3 = lin(ks[4], ks[5], hidden, num_outputs)
    return {"w1": w1, "b1": b1, "w2": w2, "b2": b2, "w3": w3, "b3": b3}


def _reference(x, p):
    """Pure-JAX reference mirroring the kernel's mixed-precision recipe."""
    cd = p["w1"].dtype
    ad = _act_dtype()
    xc = x.astype(jnp.float32).astype(cd)
    a1 = jnp.dot(xc, p["w1"], preferred_element_type=jnp.float32) + p["b1"]
    h1 = jnp.tanh(a1.astype(ad))
    a2 = jnp.dot(h1.astype(cd), p["w2"], preferred_element_type=jnp.float32) + p["b2"]
    h2 = jnp.tanh(a2.astype(ad))
    return jnp.dot(h2.astype(cd), p["w3"], preferred_element_type=jnp.float32) + p["b3"]


if __name__ == "__main__":
    key = jax.random.PRNGKey(0)
    k_x, k_p, k_x2 = jax.random.split(key, 3)

    obs_dim = 32
    hidden = 256          # RLlib default fcnet_hiddens = [256, 256]
    num_outputs = 8

    params = init_params(k_p, obs_dim, hidden, num_outputs)

    # Primary check: tiny rollout-sized batch (single grid step).
    batch = 8
    x = jax.random.normal(k_x, (batch, obs_dim), jnp.float32)
    out = jax.block_until_ready(fc_net_forward(x, params))
    ref = _reference(x, params)
    assert out.shape == (batch, num_outputs)
    assert jnp.allclose(out, ref, atol=2e-2, rtol=2e-2), "mismatch vs reference (B=8)"

    # Second check: batch not a multiple of the tile -> exercises padding policy
    # and the >=2-step (megacore-friendly) grid path.
    batch2 = 24
    x2 = jax.random.normal(k_x2, (batch2, obs_dim), jnp.float32)
    out2 = jax.block_until_ready(fc_net_forward(x2, params))
    ref2 = _reference(x2, params)
    assert out2.shape == (batch2, num_outputs)
    assert jnp.allclose(out2, ref2, atol=2e-2, rtol=2e-2), "mismatch vs reference (B=24)"

    print("KERNEL_OK")
</pallas_src>

<mosaic_0001>
module attributes {stable_mosaic.version = 11 : i64} {
  func.func @_fc_net_kernel(%arg0: i32, %arg1: memref<8x32xf32, #tpu.memory_space<vmem>>, %arg2: memref<32x256xbf16, #tpu.memory_space<vmem>>, %arg3: memref<1x256xf32, #tpu.memory_space<vmem>>, %arg4: memref<256x256xbf16, #tpu.memory_space<vmem>>, %arg5: memref<1x256xf32, #tpu.memory_space<vmem>>, %arg6: memref<256x128xbf16, #tpu.memory_space<vmem>>, %arg7: memref<1x128xf32, #tpu.memory_space<vmem>>, %arg8: memref<8x128xf32, #tpu.memory_space<vmem>>) attributes {dimension_semantics = [#tpu.dimension_semantics<parallel>], iteration_bounds = array<i64: 1>, scalar_prefetch = 0 : i64, scratch_operands = 0 : i64, tpu.core_type = #tpu.core_type<tc>, window_params = [{transform_indices = @transform_0, window_bounds = array<i64: 8, 32>}, {pipeline_mode = #tpu.pipeline_mode<synchronous>, transform_indices = @transform_1, window_bounds = array<i64: 32, 256>}, {pipeline_mode = #tpu.pipeline_mode<synchronous>, transform_indices = @transform_2, window_bounds = array<i64: 1, 256>}, {pipeline_mode = #tpu.pipeline_mode<synchronous>, transform_indices = @transform_3, window_bounds = array<i64: 256, 256>}, {pipeline_mode = #tpu.pipeline_mode<synchronous>, transform_indices = @transform_4, window_bounds = array<i64: 1, 256>}, {pipeline_mode = #tpu.pipeline_mode<synchronous>, transform_indices = @transform_5, window_bounds = array<i64: 256, 128>}, {pipeline_mode = #tpu.pipeline_mode<synchronous>, transform_indices = @transform_6, window_bounds = array<i64: 1, 128>}, {transform_indices = @transform_7, window_bounds = array<i64: 8, 128>}]} {
    %c0 = arith.constant 0 : index
    %c0_0 = arith.constant 0 : index
    %0 = vector.load %arg1[%c0, %c0_0] : memref<8x32xf32, #tpu.memory_space<vmem>>, vector<8x32xf32>
    %1 = arith.truncf %0 : vector<8x32xf32> to vector<8x32xbf16>
    %c0_1 = arith.constant 0 : index
    %c0_2 = arith.constant 0 : index
    %2 = vector.load %arg2[%c0_1, %c0_2] : memref<32x256xbf16, #tpu.memory_space<vmem>>, vector<32x256xbf16>
    %cst = arith.constant dense<0.000000e+00> : vector<8x256xf32>
    %3 = tpu.matmul %1, %2, %cst {dimension_numbers = #tpu.dot_dimension_numbers<[1], [0], [0], [1], [0, 0, 1, 1], [], []>} : vector<8x32xbf16>, vector<32x256xbf16>, vector<8x256xf32> -> vector<8x256xf32>
    %c0_3 = arith.constant 0 : index
    %c0_4 = arith.constant 0 : index
    %4 = vector.load %arg3[%c0_3, %c0_4] : memref<1x256xf32, #tpu.memory_space<vmem>>, vector<1x256xf32>
    %5 = vector.broadcast %4 : vector<1x256xf32> to vector<8x256xf32>
    %6 = arith.addf %3, %5 : vector<8x256xf32>
    %7 = math.tanh %6 : vector<8x256xf32>
    %8 = arith.truncf %7 : vector<8x256xf32> to vector<8x256xbf16>
    %c0_5 = arith.constant 0 : index
    %c0_6 = arith.constant 0 : index
    %9 = vector.load %arg4[%c0_5, %c0_6] : memref<256x256xbf16, #tpu.memory_space<vmem>>, vector<256x256xbf16>
    %cst_7 = arith.constant dense<0.000000e+00> : vector<8x256xf32>
    %10 = tpu.matmul %8, %9, %cst_7 {dimension_numbers = #tpu.dot_dimension_numbers<[1], [0], [0], [1], [0, 0, 1, 1], [], []>} : vector<8x256xbf16>, vector<256x256xbf16>, vector<8x256xf32> -> vector<8x256xf32>
    %c0_8 = arith.constant 0 : index
    %c0_9 = arith.constant 0 : index
    %11 = vector.load %arg5[%c0_8, %c0_9] : memref<1x256xf32, #tpu.memory_space<vmem>>, vector<1x256xf32>
    %12 = vector.broadcast %11 : vector<1x256xf32> to vector<8x256xf32>
    %13 = arith.addf %10, %12 : vector<8x256xf32>
    %14 = math.tanh %13 : vector<8x256xf32>
    %15 = arith.truncf %14 : vector<8x256xf32> to vector<8x256xbf16>
    %c0_10 = arith.constant 0 : index
    %c0_11 = arith.constant 0 : index
    %16 = vector.load %arg6[%c0_10, %c0_11] : memref<256x128xbf16, #tpu.memory_space<vmem>>, vector<256x128xbf16>
    %cst_12 = arith.constant dense<0.000000e+00> : vector<8x128xf32>
    %17 = tpu.matmul %15, %16, %cst_12 {dimension_numbers = #tpu.dot_dimension_numbers<[1], [0], [0], [1], [0, 0, 1, 1], [], []>} : vector<8x256xbf16>, vector<256x128xbf16>, vector<8x128xf32> -> vector<8x128xf32>
    %c0_13 = arith.constant 0 : index
    %c0_14 = arith.constant 0 : index
    %18 = vector.load %arg7[%c0_13, %c0_14] : memref<1x128xf32, #tpu.memory_space<vmem>>, vector<1x128xf32>
    %19 = vector.broadcast %18 : vector<1x128xf32> to vector<8x128xf32>
    %20 = arith.addf %17, %19 : vector<8x128xf32>
    %c0_15 = arith.constant 0 : index
    %c0_16 = arith.constant 0 : index
    %21 = vector.load %arg8[%c0_15, %c0_16] : memref<8x128xf32, #tpu.memory_space<vmem>>, vector<8x128xf32>
    tpu.vector_store %arg8[%c0_15, %c0_16], %20 {strides = array<i32>} : memref<8x128xf32, #tpu.memory_space<vmem>>, vector<8x128xf32>,
    return
  }
  func.func @transform_0(%arg0: i32) -> (i32, i32) {
    %c0_i32 = arith.constant 0 : i32
    %c0_i32_0 = arith.constant 0 : i32
    return %arg0, %c0_i32 : i32, i32
  }
  func.func @transform_1(%arg0: i32) -> (i32, i32) {
    %c0_i32 = arith.constant 0 : i32
    %c0_i32_0 = arith.constant 0 : i32
    %c0_i32_1 = arith.constant 0 : i32
    return %c0_i32, %c0_i32_0 : i32, i32
  }
  func.func @transform_2(%arg0: i32) -> (i32, i32) {
    %c0_i32 = arith.constant 0 : i32
    %c0_i32_0 = arith.constant 0 : i32
    %c0_i32_1 = arith.constant 0 : i32
    return %c0_i32, %c0_i32_0 : i32, i32
  }
  func.func @transform_3(%arg0: i32) -> (i32, i32) {
    %c0_i32 = arith.constant 0 : i32
    %c0_i32_0 = arith.constant 0 : i32
    %c0_i32_1 = arith.constant 0 : i32
    return %c0_i32, %c0_i32_0 : i32, i32
  }
  func.func @transform_4(%arg0: i32) -> (i32, i32) {
    %c0_i32 = arith.constant 0 : i32
    %c0_i32_0 = arith.constant 0 : i32
    %c0_i32_1 = arith.constant 0 : i32
    return %c0_i32, %c0_i32_0 : i32, i32
  }
  func.func @transform_5(%arg0: i32) -> (i32, i32) {
    %c0_i32 = arith.constant 0 : i32
    %c0_i32_0 = arith.constant 0 : i32
    %c0_i32_1 = arith.constant 0 : i32
    return %c0_i32, %c0_i32_0 : i32, i32
  }
  func.func @transform_6(%arg0: i32) -> (i32, i32) {
    %c0_i32 = arith.constant 0 : i32
    %c0_i32_0 = arith.constant 0 : i32
    %c0_i32_1 = arith.constant 0 : i32
    return %c0_i32, %c0_i32_0 : i32, i32
  }
  func.func @transform_7(%arg0: i32) -> (i32, i32) {
    %c0_i32 = arith.constant 0 : i32
    %c0_i32_0 = arith.constant 0 : i32
    return %arg0, %c0_i32 : i32, i32
  }
}

</mosaic_0001>

<bundles_post_ra>
// kernel: tpu_custom_call.1
= control target key start
LH: loop header
LB: loop body
LE: loop exit
PB: predicated region body
PF: predicated region fallthrough
CT: control target
= control target key end

     0   :  { %12 = vsyncpa [#allocation3], 0  ;;  %s1017_s0 = inlined_call_operand.hbm [shape: f32[8,32], index: 0, kind: input, shape index: {}]   ;;  %s1018_s1 = inlined_call_operand.hbm [shape: bf16[32,256], index: 1, kind: input, shape index: {}]   ;;  %s1019_s2 = inlined_call_operand.vmem [shape: f32[1,256], index: 2, kind: input, shape index: {}]   ;;  %s1020_s3 = inlined_call_operand.hbm [shape: bf16[256,256], index: 3, kind: input, shape index: {}]   ;;  %s1021_s4 = inlined_call_operand.vmem [shape: f32[1,256], index: 4, kind: input, shape index: {}]   ;;  %s1022_s5 = inlined_call_operand.hbm [shape: bf16[256,128], index: 5, kind: input, shape index: {}]   ;;  %s1023_s6 = inlined_call_operand.vmem [shape: f32[1,128], index: 6, kind: input, shape index: {}]   ;;  %s1024_s7 = inlined_call_operand.hbm [shape: f32[8,128], index: 7, kind: output, shape index: {}]  }
   0x1   :  { %13 = vsyncpa [#allocation6], 0 }
   0x2   :  { %14 = vsyncpa [#allocation9], 0 }
   0x3   :  { %15 = vsyncpa [#allocation4], 0  ;;  %s892_s24 = smov [#allocation5]   ;;  %s774_s28 = scalar_lea.hbm %s1018_s1, 512 }
   0x4   :  { %s31_s25 = sshll.u32 %s892_s24, 4  ;;  %p775_p0 = scmp.ne.s32.totalorder %s1018_s1, %s774_s28  ;;  %s32_s25 = int_to_ptr.vmem [resolvable:$true] %s31_s25 }
   0x5   :  { %p778_p1 = scmp.lt.u32.totalorder %s774_s28, %s1018_s1 }
   0x7   :  { %p780_p2 = pnand %p778_p1, %p775_p0 }
   0x9   :  { %783 = shalt.err (!%p780_p2)
}
   0xa   :  { %s784_s10 = scalar_lea.vmem %s32_s25, 512  ;;  %p789_p4 = scmp.lt.s32.totalorder %s32_s25, %s32_s25 }
   0xb   :  { %p785_p3 = scmp.ne.s32.totalorder %s32_s25, %s784_s10  ;;  %p790_p5 = scmp.lt.s32.totalorder %s784_s10, %s784_s10 }
   0xd   :  { %p791_p6 = por %p790_p5, %p789_p4 }
   0xf   :  { %p792_p7 = pnand %p791_p6, %p785_p3 }
  0x11   :  { %795 = shalt.err (!%p792_p7)
}
  0x12   :  { %s893_s11 = smov 128   ;;  %s894_s12 = smov 8  }
  0x13   :  { %37 = dma.hbm_to_vmem [thread:$0]  %s1018_s1, 512, %s32_s25, [#allocation6], %s893_s11, %s893_s11, %s894_s12  }
  0x14   :  { %s895_s15 = smov [#allocation2]   ;;  %s896_s17 = smov [#allocation7]  }
  0x15   :  { %s22_s16 = sshll.u32 %s895_s15, 4  ;;  %s45_s18 = sshll.u32 %s896_s17, 4  ;;  %s23_s16 = int_to_ptr.vmem [resolvable:$true] %s22_s16  ;;  %s46_s18 = int_to_ptr.vmem [resolvable:$true] %s45_s18 }
  0x16   :  { %s796_s21 = scalar_lea.hbm %s1017_s0, 128 }
  0x17   :  { %p797_p8 = scmp.ne.s32.totalorder %s1017_s0, %s796_s21  ;;  %p800_p9 = scmp.lt.u32.totalorder %s796_s21, %s1017_s0 }
  0x19   :  { %p802_p10 = pnand %p800_p9, %p797_p8 }
  0x1b   :  { %805 = shalt.err (!%p802_p10)
}
  0x1c   :  { %s806_s1 = scalar_lea.vmem %s23_s16, 128  ;;  %p811_p12 = scmp.lt.s32.totalorder %s23_s16, %s23_s16 }
  0x1d   :  { %p807_p11 = scmp.ne.s32.totalorder %s23_s16, %s806_s1  ;;  %p812_p13 = scmp.lt.s32.totalorder %s806_s1, %s806_s1 }
  0x1f   :  { %p813_p0 = por %p812_p13, %p811_p12 }
  0x21   :  { %p814_p1 = pnand %p813_p0, %p807_p11 }
  0x23   :  { %817 = shalt.err (!%p814_p1)
}
  0x24   :  { %25 = dma.hbm_to_vmem [thread:$0]  %s1017_s0, 128, %s23_s16, [#allocation3]  }
  0x25   :  { %s818_s30 = scalar_lea.hbm %s1020_s3, 4096 }
  0x26   :  { %p819_p2 = scmp.ne.s32.totalorder %s1020_s3, %s818_s30  ;;  %p822_p3 = scmp.lt.u32.totalorder %s818_s30, %s1020_s3 }
  0x28   :  { %p824_p4 = pnand %p822_p3, %p819_p2 }
  0x2a   :  { %827 = shalt.err (!%p824_p4)
}
  0x2b   :  { %s828_s14 = scalar_lea.vmem %s46_s18, 4096  ;;  %p833_p6 = scmp.lt.s32.totalorder %s46_s18, %s46_s18 }
  0x2c   :  { %p829_p5 = scmp.ne.s32.totalorder %s46_s18, %s828_s14  ;;  %p834_p7 = scmp.lt.s32.totalorder %s828_s14, %s828_s14 }
  0x2e   :  { %p835_p8 = por %p834_p7, %p833_p6 }
  0x30   :  { %p836_p9 = pnand %p835_p8, %p829_p5 }
  0x32   :  { %839 = shalt.err (!%p836_p9)
}
  0x33   :  { %51 = dma.hbm_to_vmem [thread:$0]  %s1020_s3, 4096, %s46_s18, [#allocation6], %s893_s11, %s893_s11, %s894_s12  }
  0x34   :  { %s897_s16 = smov [#allocation8]   ;;  %s840_s21 = scalar_lea.hbm %s1022_s5, 2048 }
  0x35   :  { %s59_s17 = sshll.u32 %s897_s16, 4  ;;  %p841_p10 = scmp.ne.s32.totalorder %s1022_s5, %s840_s21  ;;  %s60_s17 = int_to_ptr.vmem [resolvable:$true] %s59_s17 }
  0x36   :  { %p844_p11 = scmp.lt.u32.totalorder %s840_s21, %s1022_s5 }
  0x38   :  { %p846_p12 = pnand %p844_p11, %p841_p10 }
  0x3a   :  { %849 = shalt.err (!%p846_p12)
}
  0x3b   :  { %s850_s1 = scalar_lea.vmem %s60_s17, 2048  ;;  %p855_p0 = scmp.lt.s32.totalorder %s60_s17, %s60_s17 }
  0x3c   :  { %p851_p13 = scmp.ne.s32.totalorder %s60_s17, %s850_s1  ;;  %p856_p1 = scmp.lt.s32.totalorder %s850_s1, %s850_s1 }
  0x3e   :  { %p857_p2 = por %p856_p1, %p855_p0 }
  0x40   :  { %p858_p3 = pnand %p857_p2, %p851_p13 }
  0x42   :  { %861 = shalt.err (!%p858_p3)
}
  0x43   :  { %s898_s3 = smov 64   ;;  %s899_s11 = smov 4  }
  0x44   :  { %65 = dma.hbm_to_vmem [thread:$0]  %s1022_s5, 2048, %s60_s17, [#allocation9], %s898_s3, %s898_s3, %s899_s11  }
  0x45   :  { %884 = dma.done.wait [#allocation3], 128  }
  0x46   :  { %885 = vsyncadd [#allocation3], 4294967168 }
  0x47   :  { %886 = dma.done.wait [#allocation6], 4608  }
  0x48   :  { %887 = vsyncadd [#allocation6], 4294962688 }
  0x49   :  { %888 = dma.done.wait [#allocation9], 2048  }
  0x4a   :  { %889 = vsyncadd [#allocation9], 4294965248  ;;  %v900_v0 = vmov 0   ;;  %v696_v1 = vld [vmem:[#allocation5 + $0x4] ss:$8 sps:$4 sm:$0xff]   ;;  %v81_v5 = vld [vmem:[#allocation2] sm:$0xff]  ;;  %v89_v47 = vlaneseq }
  0x4b   :  { %155 = vmatprep.mubr.bf16.mxu0 %v900_v0  ;;  %v698_v2 = vld [vmem:[#allocation5] ss:$8 sps:$4 sm:$0xff]   ;;  %123 = vmatprep.subr.bf16.mxu0 %v696_v1  ;;  %v699_v3 = vld [vmem:[#allocation5 + $0x14] ss:$8 sps:$4 sm:$0xff]   ;;  %v701_v4 = vld [vmem:[#allocation5 + $0x10] ss:$8 sps:$4 sm:$0xff]   ;;  %v82_v9 = vpack.c.bf16 %v81_v5, %v81_v5 }
  0x4c   :  { %124 = vmatpush1.bf16.msra.mxu0 %v698_v2  ;;  %v702_v6 = vld [vmem:[#allocation7 + $0x4] ss:$8 sps:$4 sm:$0xff]   ;;  %v704_v7 = vld [vmem:[#allocation7] ss:$8 sps:$4 sm:$0xff]   ;;  %v705_v8 = vld [vmem:[#allocation7 + $0x14] ss:$8 sps:$4 sm:$0xff]  }
  0x4d   :  { %125 = vmatprep.subr.bf16.mxu0 %v699_v3  ;;  %372 = vmatprep.subr.bf16.mxu1 %v702_v6  ;;  %v707_v10 = vld [vmem:[#allocation7 + $0x10] ss:$8 sps:$4 sm:$0xff]   ;;  %vm119_vm0 = vcmask 261120   ;;  %v708_v11 = vld [vmem:[#allocation7 + $0x24] ss:$8 sps:$4 sm:$0xff]   ;;  %v90_v48 = vshrl.u32 %v89_v47, 7 }
  0x4e   :  { %373 = vmatpush1.bf16.msra.mxu1 %v704_v7  ;;  %v710_v12 = vld [vmem:[#allocation7 + $0x20] ss:$8 sps:$4 sm:$0xff]   ;;  %v711_v13 = vld [vmem:[#allocation7 + $0x34] ss:$8 sps:$4 sm:$0xff]   ;;  %v713_v14 = vld [vmem:[#allocation7 + $0x30] ss:$8 sps:$4 sm:$0xff]  }
  0x4f   :  { %374 = vmatprep.subr.bf16.mxu1 %v705_v8  ;;  %v714_v15 = vld [vmem:[#allocation7 + $0x44] ss:$8 sps:$4 sm:$0xff]   ;;  %v716_v16 = vld [vmem:[#allocation7 + $0x40] ss:$8 sps:$4 sm:$0xff]   ;;  %v717_v17 = vld [vmem:[#allocation7 + $0x54] ss:$8 sps:$4 sm:$0xff]  }
  0x50   :  { %126 = vmatpush1.bf16.msra.mxu0 %v701_v4  ;;  %v719_v18 = vld [vmem:[#allocation7 + $0x50] ss:$8 sps:$4 sm:$0xff]   ;;  %v720_v19 = vld [vmem:[#allocation7 + $0x64] ss:$8 sps:$4 sm:$0xff]   ;;  %v722_v20 = vld [vmem:[#allocation7 + $0x60] ss:$8 sps:$4 sm:$0xff]  }
  0x51   :  { %v723_v21 = vld [vmem:[#allocation7 + $0x74] ss:$8 sps:$4 sm:$0xff]   ;;  %v725_v22 = vld [vmem:[#allocation7 + $0x70] ss:$8 sps:$4 sm:$0xff]   ;;  %v726_v23 = vld [vmem:[#allocation7 + $0x84] ss:$8 sps:$4 sm:$0xff]  }
  0x52   :  { %375 = vmatpush1.bf16.msra.mxu1 %v707_v10  ;;  %v728_v24 = vld [vmem:[#allocation7 + $0x80] ss:$8 sps:$4 sm:$0xff]   ;;  %v729_v25 = vld [vmem:[#allocation7 + $0x94] ss:$8 sps:$4 sm:$0xff]   ;;  %v731_v26 = vld [vmem:[#allocation7 + $0x90] ss:$8 sps:$4 sm:$0xff]  }
  0x53   :  { %614 = vmatmul.mubr.msk.bf16.vlgmr.msra.gmra.mrb[0].mxu0 %vm119_vm0, %v82_v9  ;;  %376 = vmatprep.subr.bf16.mxu1 %v708_v11  ;;  %v732_v27 = vld [vmem:[#allocation7 + $0xa4] ss:$8 sps:$4 sm:$0xff]   ;;  %v734_v28 = vld [vmem:[#allocation7 + $0xa0] ss:$8 sps:$4 sm:$0xff]   ;;  %v735_v29 = vld [vmem:[#allocation7 + $0xb4] ss:$8 sps:$4 sm:$0xff]  }
  0x54   :  { %v737_v30 = vld [vmem:[#allocation7 + $0xb0] ss:$8 sps:$4 sm:$0xff]   ;;  %v738_v31 = vld [vmem:[#allocation7 + $0xc4] ss:$8 sps:$4 sm:$0xff]   ;;  %v740_v32 = vld [vmem:[#allocation7 + $0xc0] ss:$8 sps:$4 sm:$0xff]  }
  0x55   :  { %v741_v33 = vld [vmem:[#allocation7 + $0xd4] ss:$8 sps:$4 sm:$0xff]   ;;  %v743_v34 = vld [vmem:[#allocation7 + $0xd0] ss:$8 sps:$4 sm:$0xff]   ;;  %v744_v35 = vld [vmem:[#allocation7 + $0xe4] ss:$8 sps:$4 sm:$0xff]  }
  0x56   :  { %377 = vmatpush1.bf16.msra.mxu1 %v710_v12  ;;  %v746_v36 = vld [vmem:[#allocation7 + $0xe0] ss:$8 sps:$4 sm:$0xff]   ;;  %v747_v37 = vld [vmem:[#allocation7 + $0xf4] ss:$8 sps:$4 sm:$0xff]   ;;  %v749_v38 = vld [vmem:[#allocation7 + $0xf0] ss:$8 sps:$4 sm:$0xff]  }
  0x57   :  { %378 = vmatprep.subr.bf16.mxu1 %v711_v13  ;;  %v750_v39 = vld [vmem:[#allocation8 + $0x40] sm:$0xff]   ;;  %v752_v41 = vld [vmem:[#allocation8 + $0x48] sm:$0xff]   ;;  %v754_v43 = vld [vmem:[#allocation8 + $0x50] sm:$0xff]   ;;  %v91_v49 = vsub.s32 0, %v90_v48  ;;  %v95_v51 = vsub.s32 1, %v90_v48 }
  0x58   :  { %v751_v40 = vld [vmem:[#allocation8] sm:$0xff]   ;;  %664 = vmatprep.subr.bf16.mxu0 %v750_v39  ;;  %v753_v42 = vld [vmem:[#allocation8 + $0x8] sm:$0xff]   ;;  %v755_v44 = vld [vmem:[#allocation8 + $0x10] sm:$0xff]  }
  0x59   :  { %665 = vmatpush3.bf16.msra.mxu0 %v751_v40  ;;  %v756_v45 = vld [vmem:[#allocation8 + $0x58] sm:$0xff]   ;;  %v758_v0 = vld [vmem:[#allocation8 + $0x60] sm:$0xff]   ;;  %v760_v2 = vld [vmem:[#allocation8 + $0x68] sm:$0xff]  }
  0x5a   :  { %379 = vmatpush1.bf16.msra.mxu1 %v713_v14  ;;  %666 = vmatprep.subr.bf16.mxu0 %v752_v41  ;;  %v757_v46 = vld [vmem:[#allocation8 + $0x18] sm:$0xff]   ;;  %v759_v1 = vld [vmem:[#allocation8 + $0x20] sm:$0xff]   ;;  %v761_v3 = vld [vmem:[#allocation8 + $0x28] sm:$0xff]  }
  0x5b   :  { %380 = vmatprep.subr.bf16.mxu1 %v714_v15  ;;  %v87_v50 = vld [vmem:[%s1019_s2] sm:$0x3]  ;;  %v762_v4 = vld [vmem:[#allocation8 + $0x70] sm:$0xff]  }
  0x5c   :  { %v92_v52 = vrot.slane %v87_v50, %v91_v49  ;;  %v96_v53 = vrot.slane %v87_v50, %v95_v51  ;;  %v763_v5 = vld [vmem:[#allocation8 + $0x30] sm:$0xff]   ;;  %v764_v6 = vld [vmem:[#allocation8 + $0x78] sm:$0xff]  }
  0x5d   :  { %667 = vmatpush3.bf16.msra.mxu0 %v753_v42  ;;  %v765_v7 = vld [vmem:[#allocation8 + $0x38] sm:$0xff]  }
  0x5e   :  { %381 = vmatpush1.bf16.msra.mxu1 %v716_v16  ;;  %668 = vmatprep.subr.bf16.mxu0 %v754_v43  ;;  %v200_v8 = vld [vmem:[%s1021_s4] sm:$0x3]  ;;  %s901_s4 = smov [#allocation10]  }
  0x5f   :  { %382 = vmatprep.subr.bf16.mxu1 %v717_v17  ;;  %v205_v9 = vrot.slane %v200_v8, %v91_v49  ;;  %v209_v10 = vrot.slane %v200_v8, %v95_v51  ;;  %s599_s30 = sshll.u32 %s901_s4, 4  ;;  %s600_s30 = int_to_ptr.vmem [resolvable:$true] %s599_s30 }
  0x60   :  { %s862_s8 = scalar_lea.vmem %s600_s30, 128  ;;  %p867_p5 = scmp.lt.s32.totalorder %s600_s30, %s600_s30 }
  0x61   :  { %669 = vmatpush3.bf16.msra.mxu0 %v755_v44  ;;  %p863_p4 = scmp.ne.s32.totalorder %s600_s30, %s862_s8  ;;  %p868_p6 = scmp.lt.s32.totalorder %s862_s8, %s862_s8 }
  0x62   :  { %383 = vmatpush1.bf16.msra.mxu1 %v719_v18  ;;  %670 = vmatprep.subr.bf16.mxu0 %v756_v45 }
  0x63   :  { %384 = vmatprep.subr.bf16.mxu1 %v720_v19  ;;  %p869_p7 = por %p868_p6, %p867_p5 }
  0x65   :  { %671 = vmatpush3.bf16.msra.mxu0 %v757_v46  ;;  %p870_p8 = pnand %p869_p7, %p863_p4 }
  0x66   :  { %385 = vmatpush1.bf16.msra.mxu1 %v722_v20  ;;  %672 = vmatprep.subr.bf16.mxu0 %v758_v0 }
  0x67   :  { %386 = vmatprep.subr.bf16.mxu1 %v723_v21 }
  0x69   :  { %673 = vmatpush3.bf16.msra.mxu0 %v759_v1 }
  0x6a   :  { %387 = vmatpush1.bf16.msra.mxu1 %v725_v22  ;;  %674 = vmatprep.subr.bf16.mxu0 %v760_v2  ;;  %v647_v22 = vld [vmem:[%s1023_s6] ss:$0 sm:$0xff] }
  0x6b   :  { %388 = vmatprep.subr.bf16.mxu1 %v726_v23 }
  0x6d   :  { %675 = vmatpush3.bf16.msra.mxu0 %v761_v3 }
  0x6e   :  { %389 = vmatpush1.bf16.msra.mxu1 %v728_v24  ;;  %676 = vmatprep.subr.bf16.mxu0 %v762_v4 }
  0x6f   :  { %390 = vmatprep.subr.bf16.mxu1 %v729_v25 }
  0x71   :  { %677 = vmatpush3.bf16.msra.mxu0 %v763_v5 }
  0x72   :  { %391 = vmatpush1.bf16.msra.mxu1 %v731_v26  ;;  %678 = vmatprep.subr.bf16.mxu0 %v764_v6 }
  0x73   :  { %392 = vmatprep.subr.bf16.mxu1 %v732_v27 }
  0x75   :  { %679 = vmatpush3.bf16.msra.mxu0 %v765_v7 }
  0x76   :  { %393 = vmatpush1.bf16.msra.mxu1 %v734_v28 }
  0x77   :  { %394 = vmatprep.subr.bf16.mxu1 %v735_v29 }
  0x7a   :  { %395 = vmatpush1.bf16.msra.mxu1 %v737_v30 }
  0x7b   :  { %396 = vmatprep.subr.bf16.mxu1 %v738_v31 }
  0x7e   :  { %397 = vmatpush1.bf16.msra.mxu1 %v740_v32 }
  0x7f   :  { %398 = vmatprep.subr.bf16.mxu1 %v741_v33 }
  0x82   :  { %399 = vmatpush1.bf16.msra.mxu1 %v743_v34 }
  0x83   :  { %400 = vmatprep.subr.bf16.mxu1 %v744_v35 }
  0x86   :  { %401 = vmatpush1.bf16.msra.mxu1 %v746_v36 }
  0x87   :  { %402 = vmatprep.subr.bf16.mxu1 %v747_v37 }
  0x8a   :  { %403 = vmatpush1.bf16.msra.mxu1 %v749_v38 }
 0x126   :  { %v157_v54 = vpop.f32.mrb[0].mxu0 }
 0x127   :  { %v158_v55 = vadd.f32 %v157_v54, %v92_v52  ;;  %v159_v56 = vpop.f32.mrb[1].mxu0 }
 0x128   :  { %v160_v57 = vadd.f32 %v159_v56, %v96_v53  ;;  %v161_v58 = vpop.f32.mrb[2].mxu0 }
 0x129   :  { %766 = vtanh.f32 %v158_v55  ;;  %v162_v59 = vpop.f32.mrb[3].mxu0 }
 0x12a   :  { %768 = vtanh.f32 %v160_v57 }
 0x133   :  { %v767_v60 = vpop.eup %766 }
 0x134   :  { %v769_v61 = vpop.eup %768  ;;  %v166_v63 = vpack.c.bf16 %v767_v60, %v767_v60 }
 0x135   :  { %v167_v62 = vpack.c.bf16 %v769_v61, %v769_v61 }
 0x137   :  { %404 = vmatprep.mubr.bf16.mxu1 %v167_v62 }
 0x138   :  { %405 = vmatmul.mubr.bf16.vlgmr.msra.gmra.mrb[0].mxu1 %v166_v63 }
 0x20b   :  { %v406_v11 = vpop.f32.mrb[0].mxu1 }
 0x20c   :  { %v407_v12 = vadd.f32 %v406_v11, %v205_v9  ;;  %v408_v13 = vpop.f32.mrb[1].mxu1 }
 0x20d   :  { %v409_v14 = vadd.f32 %v408_v13, %v209_v10  ;;  %v410_v15 = vpop.f32.mrb[2].mxu1 }
 0x20e   :  { %770 = vtanh.f32 %v407_v12  ;;  %v411_v16 = vpop.f32.mrb[3].mxu1 }
 0x20f   :  { %772 = vtanh.f32 %v409_v14 }
 0x218   :  { %v771_v17 = vpop.eup %770 }
 0x219   :  { %v773_v18 = vpop.eup %772  ;;  %v415_v20 = vpack.c.bf16 %v771_v17, %v771_v17 }
 0x21a   :  { %v416_v19 = vpack.c.bf16 %v773_v18, %v773_v18 }
 0x21c   :  { %584 = vmatprep.mubr.bf16.mxu0 %v416_v19 }
 0x21d   :  { %585 = vmatmul.mubr.bf16.vlgmr.msra.gmra.mrb[4].mxu0 %v415_v20 }
 0x2f0   :  { %v680_v21 = vpop.f32.mrb[4].mxu0 }
 0x2f1   :  { %v681_v23 = vpop.f32.mrb[5].mxu0 }
 0x2f2   :  { %v682_v24 = vadd.f32 %v681_v23, %v680_v21  ;;  %v683_v25 = vpop.f32.mrb[6].mxu0 }
 0x2f3   :  { %v684_v26 = vpop.f32.mrb[7].mxu0 }
 0x2f4   :  { %v587_v27 = vadd.f32 %v682_v24, %v647_v22 }
 0x2f6   :  { %592 = vst [vmem:[#allocation10] sm:$0xff] %v587_v27 }
 0x2f7   :  { %873 = shalt.err (!%p870_p8)
}
 0x2f8   :  { %s874_s6 = scalar_lea.hbm %s1024_s7, 128 }
 0x2f9   :  { %p875_p9 = scmp.ne.s32.totalorder %s1024_s7, %s874_s6  ;;  %p878_p10 = scmp.lt.u32.totalorder %s874_s6, %s1024_s7 }
 0x2fb   :  { %p880_p11 = pnand %p878_p10, %p875_p9 }
 0x2fd   :  { %883 = shalt.err (!%p880_p11)
}
 0x2fe   :  { %602 = dma.vmem_to_hbm [thread:$0]  %s600_s30, 128, %s1024_s7, [#allocation4]  }
 0x2ff   :  { %890 = dma.done.wait [#allocation4], 128  }
 0x300   :  { %891 = vsyncadd [#allocation4], 4294967168 }
 0x301   :  { %606 = vsyncpa [#allocation3], 1 }
 0x302   :  { %607 = vsyncpa [#allocation6], 1 }
 0x303   :  { %608 = vsyncpa [#allocation9], 1 }
 0x304   :  { %609 = vsyncpa [#allocation4], 1 }

</bundles_post_ra>
